<compile_context>
chip_gen: v6e
topology: v6e:2x2x1
jax: 0.10.0
libtpu: 0.0.40
codegen_flags: <defaults>
</compile_context>

<pallas_src>
import math

import jax
import jax.numpy as jnp
from jax.experimental import pallas as pl
from jax.experimental.pallas import tpu as pltpu


_LANE = 128  # lane width of the flattened 2-D view


def _round_up(x, m):
    return (x + m - 1) // m * m


def _sublane_pack(dtype):
    itemsize = max(jnp.dtype(dtype).itemsize, 1)
    return max(8, 32 // itemsize)


def _device_kind():
    try:
        return jax.devices()[0].device_kind.lower()
    except Exception:
        return ""


def _make_kernel(tm, lane, steps, rows_valid, chunk, mask_needed):
    """Build the partial-sum kernel for one tiling geometry (all args static)."""
    nchunks = tm // chunk
    nfold = chunk // 8

    def fold8(v):
        # (chunk, lane) -> (8, lane) with pure vreg adds (8-row slices are
        # exactly vreg-aligned for f32, so no XLU / relayout is involved).
        out = v[0:8, :]
        for r in range(1, nfold):
            out = out + v[r * 8:(r + 1) * 8, :]
        return out

    def kernel(x_ref, t_ref, out_i_ref, out_s_ref):
        i = pl.program_id(0)
        k = pl.program_id(1)

        # The output blocks double as the cross-step accumulators (index_map
        # depends only on i, so they stay resident across the k axis).
        @pl.when(k == 0)
        def _init():
            out_i_ref[...] = jnp.zeros_like(out_i_ref)
            out_s_ref[...] = jnp.zeros_like(out_s_ref)

        if mask_needed:
            block_row0 = (i * steps + k) * tm
            local_rows = jax.lax.broadcasted_iota(jnp.int32, (chunk, lane), 0)

        def body(j, carry):
            acc_i, acc_s = carry
            r0 = j * chunk
            if not isinstance(r0, int):
                r0 = pl.multiple_of(r0, chunk)
            # Native dtype streams from HBM; upcast at load (free VPU convert).
            x = x_ref[pl.ds(r0, chunk), :].astype(jnp.float32)
            t = t_ref[pl.ds(r0, chunk), :].astype(jnp.float32)
            # sigmoid as a single EUP transcendental.
            s = 0.5 * jnp.tanh(0.5 * x) + 0.5
            prod = s * t
            tot = s + t
            if mask_needed:
                gid = block_row0 + r0 + local_rows
                valid = gid < rows_valid
                prod = jnp.where(valid, prod, 0.0)
                tot = jnp.where(valid, tot, 0.0)
            return acc_i + prod, acc_s + tot

        init = (jnp.zeros((chunk, lane), jnp.float32),
                jnp.zeros((chunk, lane), jnp.float32))
        if nchunks <= 4:
            acc = init
            for j in range(nchunks):
                acc = body(j, acc)
            acc_i, acc_s = acc
        else:
            acc_i, acc_s = jax.lax.fori_loop(0, nchunks, body, init)

        # Only a 4 KiB slab is read-modified-written per grid step.
        out_i_ref[...] += fold8(acc_i)
        out_s_ref[...] += fold8(acc_s)

    return kernel


def iou_loss(inputs, targets, smooth=1.0, exp=1):
    """Pallas implementation of IoULoss.forward (returns a scalar loss)."""
    assert inputs.shape == targets.shape

    # Non-float targets (bool / int masks) are cast once in the wrapper.
    if not jnp.issubdtype(targets.dtype, jnp.floating):
        targets = targets.astype(jnp.float32)

    total = math.prod(inputs.shape)
    x_flat = inputs.reshape(-1)          # contiguous reshape: free bitcast
    t_flat = targets.reshape(-1)

    rows = total // _LANE
    rem = total - rows * _LANE

    # Sub-lane tail (< 128 elements): plain-JAX epilogue, negligible work.
    if rem:
        xt = jax.nn.sigmoid(x_flat[rows * _LANE:].astype(jnp.float32))
        tt = t_flat[rows * _LANE:].astype(jnp.float32)
        tail_i = (xt * tt).sum()
        tail_s = (xt + tt).sum()
    else:
        tail_i = jnp.float32(0.0)
        tail_s = jnp.float32(0.0)

    if rows == 0:
        intersection = tail_i
        total_sum = tail_s
    else:
        if rem:
            # Prefix view for the bulk; tail already handled above.
            x2d = x_flat[: rows * _LANE].reshape(rows, _LANE)
            t2d = t_flat[: rows * _LANE].reshape(rows, _LANE)
        else:
            x2d = x_flat.reshape(rows, _LANE)
            t2d = t_flat.reshape(rows, _LANE)

        # ---- Tiling geometry (splits chosen before tm) -------------------
        kind = _device_kind()
        multi_tc = any(s in kind for s in ("v7", "v4", "v5p"))
        big_vmem = ("v7" in kind) or ("v6" in kind)
        blk_bytes = (4 if big_vmem else 2) * 1024 * 1024   # per-input block

        pack = max(_sublane_pack(inputs.dtype), _sublane_pack(targets.dtype))
        splits = 2 if (multi_tc and rows >= 2 * pack) else 1
        rows_per_split = pl.cdiv(rows, splits)

        itemsize = max(jnp.dtype(inputs.dtype).itemsize, 1)
        tm_cap = max(pack, (blk_bytes // (_LANE * itemsize)) // pack * pack)
        tm = min(tm_cap, _round_up(rows_per_split, pack))
        steps = pl.cdiv(rows_per_split, tm)
        mask_needed = splits * steps * tm > rows
        chunk = 32 if tm % 32 == 0 else (16 if tm % 16 == 0 else 8)

        kernel = _make_kernel(tm=tm, lane=_LANE, steps=steps, rows_valid=rows,
                              chunk=chunk, mask_needed=mask_needed)

        out_shape = jax.ShapeDtypeStruct((splits * 8, _LANE), jnp.float32)
        out_i, out_s = pl.pallas_call(
            kernel,
            out_shape=(out_shape, out_shape),
            grid_spec=pltpu.PrefetchScalarGridSpec(
                num_scalar_prefetch=0,
                grid=(splits, steps),
                in_specs=[
                    pl.BlockSpec((tm, _LANE), lambda i, k: (i * steps + k, 0)),
                    pl.BlockSpec((tm, _LANE), lambda i, k: (i * steps + k, 0)),
                ],
                out_specs=[
                    pl.BlockSpec((8, _LANE), lambda i, k: (i, 0)),
                    pl.BlockSpec((8, _LANE), lambda i, k: (i, 0)),
                ],
            ),
            compiler_params=pltpu.CompilerParams(
                dimension_semantics=("parallel", "arbitrary"),
                vmem_limit_bytes=32 * 1024 * 1024,
            ),
        )(x2d, t2d)

        intersection = out_i.sum() + tail_i
        total_sum = out_s.sum() + tail_s

    union = total_sum - intersection
    iou = (intersection + jnp.float32(smooth)) / (union + jnp.float32(smooth))
    return 1.0 - iou ** exp


def _iou_loss_ref(inputs, targets, smooth=1.0, exp=1):
    x = jax.nn.sigmoid(inputs.astype(jnp.float32)).reshape(inputs.shape[0], -1)
    t = targets.astype(jnp.float32).reshape(targets.shape[0], -1)
    intersection = (x * t).sum()
    total = (x + t).sum()
    union = total - intersection
    iou = (intersection + smooth) / (union + smooth)
    return 1.0 - iou ** exp


if __name__ == "__main__":
    key = jax.random.PRNGKey(0)
    k1, k2 = jax.random.split(key)

    # Small segmentation-style shapes: (B, C, H, W).
    B, C, H, W = 2, 4, 16, 16
    logits = jax.random.normal(k1, (B, C, H, W), dtype=jnp.float32)
    targets = (jax.random.uniform(k2, (B, C, H, W)) > 0.5).astype(jnp.float32)

    loss = iou_loss(logits, targets, smooth=1.0, exp=1)
    loss = jax.block_until_ready(loss)

    ref = _iou_loss_ref(logits, targets, smooth=1.0, exp=1)
    assert jnp.allclose(loss, ref, atol=1e-5, rtol=1e-5), (loss, ref)

    print("KERNEL_OK")
</pallas_src>

<mosaic_0001>
module attributes {stable_mosaic.version = 11 : i64} {
  func.func @kernel(%arg0: i32, %arg1: i32, %arg2: memref<16x128xf32, #tpu.memory_space<vmem>>, %arg3: memref<16x128xf32, #tpu.memory_space<vmem>>, %arg4: memref<8x128xf32, #tpu.memory_space<vmem>>, %arg5: memref<8x128xf32, #tpu.memory_space<vmem>>) attributes {dimension_semantics = [#tpu.dimension_semantics<parallel>, #tpu.dimension_semantics<arbitrary>], iteration_bounds = array<i64: 1, 1>, scalar_prefetch = 0 : i64, scratch_operands = 0 : i64, tpu.core_type = #tpu.core_type<tc>, window_params = [{transform_indices = @transform_0, window_bounds = array<i64: 16, 128>}, {transform_indices = @transform_1, window_bounds = array<i64: 16, 128>}, {transform_indices = @transform_2, window_bounds = array<i64: 8, 128>}, {transform_indices = @transform_3, window_bounds = array<i64: 8, 128>}]} {
    %c0_i32 = arith.constant 0 : i32
    %0 = arith.cmpi eq, %arg1, %c0_i32 : i32
    %1 = arith.extui %0 : i1 to i32
    %c0_i32_0 = arith.constant 0 : i32
    %2 = arith.cmpi ne, %1, %c0_i32_0 : i32
    scf.if %2 {
      %cst_16 = arith.constant 0.000000e+00 : f32
      %30 = vector.broadcast %cst_16 : f32 to vector<8x128xf32>
      %c0_17 = arith.constant 0 : index
      %c0_18 = arith.constant 0 : index
      %31 = vector.load %arg4[%c0_17, %c0_18] : memref<8x128xf32, #tpu.memory_space<vmem>>, vector<8x128xf32>
      tpu.vector_store %arg4[%c0_17, %c0_18], %30 {strides = array<i32>} : memref<8x128xf32, #tpu.memory_space<vmem>>, vector<8x128xf32>,
      %cst_19 = arith.constant 0.000000e+00 : f32
      %32 = vector.broadcast %cst_19 : f32 to vector<8x128xf32>
      %c0_20 = arith.constant 0 : index
      %c0_21 = arith.constant 0 : index
      %33 = vector.load %arg5[%c0_20, %c0_21] : memref<8x128xf32, #tpu.memory_space<vmem>>, vector<8x128xf32>
      tpu.vector_store %arg5[%c0_20, %c0_21], %32 {strides = array<i32>} : memref<8x128xf32, #tpu.memory_space<vmem>>, vector<8x128xf32>,
    } else {
    }
    %cst = arith.constant 0.000000e+00 : f32
    %3 = vector.broadcast %cst : f32 to vector<16x128xf32>
    %cst_1 = arith.constant 0.000000e+00 : f32
    %4 = vector.broadcast %cst_1 : f32 to vector<16x128xf32>
    %c0 = arith.constant 0 : index
    %c0_2 = arith.constant 0 : index
    %5 = vector.load %arg2[%c0, %c0_2] : memref<16x128xf32, #tpu.memory_space<vmem>>, vector<16x128xf32>
    %c0_3 = arith.constant 0 : index
    %c0_4 = arith.constant 0 : index
    %6 = vector.load %arg3[%c0_3, %c0_4] : memref<16x128xf32, #tpu.memory_space<vmem>>, vector<16x128xf32>
    %cst_5 = arith.constant 5.000000e-01 : f32
    %7 = vector.broadcast %cst_5 : f32 to vector<16x128xf32>
    %8 = arith.mulf %7, %5 : vector<16x128xf32>
    %9 = math.tanh %8 : vector<16x128xf32>
    %cst_6 = arith.constant 5.000000e-01 : f32
    %10 = vector.broadcast %cst_6 : f32 to vector<16x128xf32>
    %11 = arith.mulf %10, %9 : vector<16x128xf32>
    %cst_7 = arith.constant 5.000000e-01 : f32
    %12 = vector.broadcast %cst_7 : f32 to vector<16x128xf32>
    %13 = arith.addf %11, %12 : vector<16x128xf32>
    %14 = arith.mulf %13, %6 : vector<16x128xf32>
    %15 = arith.addf %13, %6 : vector<16x128xf32>
    %16 = arith.addf %3, %14 : vector<16x128xf32>
    %17 = arith.addf %4, %15 : vector<16x128xf32>
    %c0_8 = arith.constant 0 : index
    %c0_9 = arith.constant 0 : index
    %18 = vector.load %arg4[%c0_8, %c0_9] : memref<8x128xf32, #tpu.memory_space<vmem>>, vector<8x128xf32>
    %19 = vector.extract_strided_slice %16 {offsets = [0, 0], sizes = [8, 128], strides = [1, 1]} : vector<16x128xf32> to vector<8x128xf32>
    %20 = vector.extract_strided_slice %16 {offsets = [8, 0], sizes = [8, 128], strides = [1, 1]} : vector<16x128xf32> to vector<8x128xf32>
    %21 = arith.addf %19, %20 : vector<8x128xf32>
    %22 = arith.addf %18, %21 : vector<8x128xf32>
    %c0_10 = arith.constant 0 : index
    %c0_11 = arith.constant 0 : index
    %23 = vector.load %arg4[%c0_10, %c0_11] : memref<8x128xf32, #tpu.memory_space<vmem>>, vector<8x128xf32>
    tpu.vector_store %arg4[%c0_10, %c0_11], %22 {strides = array<i32>} : memref<8x128xf32, #tpu.memory_space<vmem>>, vector<8x128xf32>,
    %c0_12 = arith.constant 0 : index
    %c0_13 = arith.constant 0 : index
    %24 = vector.load %arg5[%c0_12, %c0_13] : memref<8x128xf32, #tpu.memory_space<vmem>>, vector<8x128xf32>
    %25 = vector.extract_strided_slice %17 {offsets = [0, 0], sizes = [8, 128], strides = [1, 1]} : vector<16x128xf32> to vector<8x128xf32>
    %26 = vector.extract_strided_slice %17 {offsets = [8, 0], sizes = [8, 128], strides = [1, 1]} : vector<16x128xf32> to vector<8x128xf32>
    %27 = arith.addf %25, %26 : vector<8x128xf32>
    %28 = arith.addf %24, %27 : vector<8x128xf32>
    %c0_14 = arith.constant 0 : index
    %c0_15 = arith.constant 0 : index
    %29 = vector.load %arg5[%c0_14, %c0_15] : memref<8x128xf32, #tpu.memory_space<vmem>>, vector<8x128xf32>
    tpu.vector_store %arg5[%c0_14, %c0_15], %28 {strides = array<i32>} : memref<8x128xf32, #tpu.memory_space<vmem>>, vector<8x128xf32>,
    return
  }
  func.func @transform_0(%arg0: i32, %arg1: i32) -> (i32, i32) {
    %c1_i32 = arith.constant 1 : i32
    %0 = arith.muli %arg0, %c1_i32 : i32
    %1 = arith.addi %0, %arg1 : i32
    %c0_i32 = arith.constant 0 : i32
    %c0_i32_0 = arith.constant 0 : i32
    return %1, %c0_i32 : i32, i32
  }
  func.func @transform_1(%arg0: i32, %arg1: i32) -> (i32, i32) {
    %c1_i32 = arith.constant 1 : i32
    %0 = arith.muli %arg0, %c1_i32 : i32
    %1 = arith.addi %0, %arg1 : i32
    %c0_i32 = arith.constant 0 : i32
    %c0_i32_0 = arith.constant 0 : i32
    return %1, %c0_i32 : i32, i32
  }
  func.func @transform_2(%arg0: i32, %arg1: i32) -> (i32, i32) {
    %c0_i32 = arith.constant 0 : i32
    %c0_i32_0 = arith.constant 0 : i32
    return %arg0, %c0_i32 : i32, i32
  }
  func.func @transform_3(%arg0: i32, %arg1: i32) -> (i32, i32) {
    %c0_i32 = arith.constant 0 : i32
    %c0_i32_0 = arith.constant 0 : i32
    return %arg0, %c0_i32 : i32, i32
  }
}

</mosaic_0001>

<bundles_post_ra>
// kernel: tpu_custom_call.1
= control target key start
LH: loop header
LB: loop body
LE: loop exit
PB: predicated region body
PF: predicated region fallthrough
CT: control target
= control target key end

     0   :  { %9 = vsyncpa [#allocation3], 0  ;;  %s256_s0 = inlined_call_operand.hbm [shape: f32[16,128], index: 0, kind: input, shape index: {}]   ;;  %s257_s1 = inlined_call_operand.hbm [shape: f32[16,128], index: 1, kind: input, shape index: {}]   ;;  %s258_s2 = inlined_call_operand.hbm [shape: f32[8,128], index: 2, kind: output, shape index: {0}]   ;;  %s259_s3 = inlined_call_operand.hbm [shape: f32[8,128], index: 3, kind: output, shape index: {1}]  }
   0x1   :  { %10 = vsyncpa [#allocation6], 0 }
   0x2   :  { %11 = vsyncpa [#allocation4], 0 }
   0x3   :  { %12 = vsyncpa [#allocation9], 0  ;;  %s218_s12 = smov [#allocation2]  }
   0x4   :  { %s22_s13 = sshll.u32 %s218_s12, 4  ;;  %s23_s13 = int_to_ptr.vmem [resolvable:$true] %s22_s13 }
   0x5   :  { %s138_s14 = scalar_lea.vmem %s23_s13, 256  ;;  %p143_p1 = scmp.lt.s32.totalorder %s23_s13, %s23_s13 }
   0x6   :  { %p139_p0 = scmp.ne.s32.totalorder %s23_s13, %s138_s14  ;;  %p144_p2 = scmp.lt.s32.totalorder %s138_s14, %s138_s14 }
   0x8   :  { %p145_p3 = por %p144_p2, %p143_p1 }
   0xa   :  { %p146_p4 = pnand %p145_p3, %p139_p0 }
   0xc   :  { %149 = shalt.err (!%p146_p4)
}
   0xd   :  { %s219_s15 = smov 128   ;;  %s220_s16 = smov 8  }
   0xe   :  { %28 = dma.hbm_to_vmem [thread:$0]  %s256_s0, 256, %s23_s13, [#allocation3], %s219_s15, %s219_s15, %s220_s16  }
   0xf   :  { %s221_s19 = smov [#allocation5]  }
  0x10   :  { %s38_s20 = sshll.u32 %s221_s19, 4  ;;  %s39_s20 = int_to_ptr.vmem [resolvable:$true] %s38_s20 }
  0x11   :  { %s158_s21 = scalar_lea.vmem %s39_s20, 256  ;;  %p163_p6 = scmp.lt.s32.totalorder %s39_s20, %s39_s20 }
  0x12   :  { %p159_p5 = scmp.ne.s32.totalorder %s39_s20, %s158_s21  ;;  %p164_p7 = scmp.lt.s32.totalorder %s158_s21, %s158_s21 }
  0x14   :  { %p165_p8 = por %p164_p7, %p163_p6 }
  0x16   :  { %p166_p9 = pnand %p165_p8, %p159_p5 }
  0x18   :  { %169 = shalt.err (!%p166_p9)
}
  0x19   :  { %44 = dma.hbm_to_vmem [thread:$0]  %s257_s1, 256, %s39_s20, [#allocation6], %s219_s15, %s219_s15, %s220_s16  }
  0x1a   :  { %210 = dma.done.wait [#allocation3], 256  }
  0x1b   :  { %211 = vsyncadd [#allocation3], 4294967040 }
  0x1c   :  { %212 = dma.done.wait [#allocation6], 256  }
  0x1d   :  { %213 = vsyncadd [#allocation6], 4294967040  ;;  %v61_v0 = vld [vmem:[#allocation2] sm:$0xff]  ;;  %v62_v1 = vld [vmem:[#allocation2 + $0x8] sm:$0xff]  ;;  %s222_s0 = smov [#allocation7]   ;;  %s223_s24 = smov [#allocation8]  }
  0x1e   :  { %v65_v2 = vmul.f32 0.5, %v61_v0  ;;  %v66_v3 = vmul.f32 0.5, %v62_v1  ;;  %v63_v7 = vld [vmem:[#allocation5] sm:$0xff]  ;;  %v64_v9 = vld [vmem:[#allocation5 + $0x8] sm:$0xff]  ;;  %s95_s1 = sshll.u32 %s222_s0, 4  ;;  %s105_s25 = sshll.u32 %s223_s24, 4  ;;  %s96_s1 = int_to_ptr.vmem [resolvable:$true] %s95_s1  ;;  %s106_s25 = int_to_ptr.vmem [resolvable:$true] %s105_s25 }
  0x1f   :  { %s170_s26 = scalar_lea.vmem %s96_s1, 128  ;;  %p175_p11 = scmp.lt.s32.totalorder %s96_s1, %s96_s1 }
  0x20   :  { %126 = vtanh.f32 %v65_v2  ;;  %p171_p10 = scmp.ne.s32.totalorder %s96_s1, %s170_s26  ;;  %p176_p12 = scmp.lt.s32.totalorder %s170_s26, %s170_s26 }
  0x21   :  { %128 = vtanh.f32 %v66_v3 }
  0x22   :  { %p177_p13 = por %p176_p12, %p175_p11 }
  0x24   :  { %p178_p0 = pnand %p177_p13, %p171_p10 }
  0x2d   :  { %v127_v4 = vpop.eup %126 }
  0x2e   :  { %v129_v5 = vpop.eup %128  ;;  %v69_v6 = vmul.f32 0.5, %v127_v4 }
  0x2f   :  { %v70_v8 = vmul.f32 0.5, %v129_v5 }
  0x30   :  { %v71_v10 = vadd.f32 0.5, %v69_v6 }
  0x31   :  { %v72_v11 = vadd.f32 0.5, %v70_v8 }
  0x32   :  { %v73_v12 = vmul.f32 %v71_v10, %v63_v7  ;;  %v75_v13 = vadd.f32 %v71_v10, %v63_v7 }
  0x33   :  { %v74_v14 = vmul.f32 %v72_v11, %v64_v9  ;;  %v76_v15 = vadd.f32 %v72_v11, %v64_v9 }
  0x35   :  { %v82_v16 = vadd.f32 %v74_v14, %v73_v12  ;;  %v86_v17 = vadd.f32 %v76_v15, %v75_v13 }
  0x37   :  { %84 = vst [vmem:[#allocation7] sm:$0xff] %v82_v16  ;;  %88 = vst [vmem:[#allocation8] sm:$0xff] %v86_v17 }
  0x38   :  { %181 = shalt.err (!%p178_p0)
}
  0x39   :  { %98 = dma.vmem_to_hbm [thread:$0]  %s96_s1, 128, %s258_s2, [#allocation4]  }
  0x3a   :  { %s190_s29 = scalar_lea.vmem %s106_s25, 128  ;;  %p195_p2 = scmp.lt.s32.totalorder %s106_s25, %s106_s25 }
  0x3b   :  { %p191_p1 = scmp.ne.s32.totalorder %s106_s25, %s190_s29  ;;  %p196_p3 = scmp.lt.s32.totalorder %s190_s29, %s190_s29 }
  0x3d   :  { %p197_p4 = por %p196_p3, %p195_p2 }
  0x3f   :  { %p198_p5 = pnand %p197_p4, %p191_p1 }
  0x41   :  { %201 = shalt.err (!%p198_p5)
}
  0x42   :  { %108 = dma.vmem_to_hbm [thread:$0]  %s106_s25, 128, %s259_s3, [#allocation9]  }
  0x43   :  { %214 = dma.done.wait [#allocation4], 128  }
  0x44   :  { %215 = vsyncadd [#allocation4], 4294967168 }
  0x45   :  { %216 = dma.done.wait [#allocation9], 128  }
  0x46   :  { %217 = vsyncadd [#allocation9], 4294967168 }
  0x47   :  { %115 = vsyncpa [#allocation3], 1 }
  0x48   :  { %116 = vsyncpa [#allocation6], 1 }
  0x49   :  { %117 = vsyncpa [#allocation4], 1 }
  0x4a   :  { %118 = vsyncpa [#allocation9], 1 }

</bundles_post_ra>
